<compile_context>
chip_gen: v7x
topology: tpu7x:2x2x1
jax: 0.10.0
libtpu: 0.0.40
codegen_flags: <defaults>
</compile_context>

<pallas_src>
import numpy as np
import jax
import jax.numpy as jnp
from jax.experimental import pallas as pl
from jax.experimental.pallas import tpu as pltpu


# ----------------------------------------------------------------------------
# in-kernel helpers
# ----------------------------------------------------------------------------
def _store_tap(patches_ref, t, plane, d, masks, cin, hw):
    """Write tap `t` (shifted-by-`d`, border-masked copy of `plane`) into the
    im2col scratch rows [t*cin, (t+1)*cin).  plane: (cin, hw) bf16,
    masks: (9, hw) bf16 in {0,1}.  Positions whose source is out of range are
    explicitly zeroed, so the scratch never needs a full clear."""
    lo = max(-d, 0)
    hi = min(hw, hw - d)
    blk = slice(t * cin, (t + 1) * cin)
    if lo > 0:
        patches_ref[blk, 0:lo] = jnp.zeros((cin, lo), patches_ref.dtype)
    if hi < hw:
        patches_ref[blk, hi:hw] = jnp.zeros((cin, hw - hi), patches_ref.dtype)
    patches_ref[blk, lo:hi] = plane[:, lo + d:hi + d] * masks[t:t + 1, lo:hi]


def _gated_matmul(w_ref, b_ref, rhs):
    """Fused gated conv matmul: y = W @ rhs + b, return feat * sigmoid(gate).
    w_ref: (2C, K) bf16, b_ref: (2C, 1) f32, rhs: (K, HW) bf16 -> (C, HW) f32."""
    y = jnp.dot(w_ref[...], rhs, preferred_element_type=jnp.float32) + b_ref[...]
    c = y.shape[0] // 2
    return y[:c] * jax.nn.sigmoid(y[c:])


def _gate_conv3x3_s1(x_bf16, w_ref, b_ref, masks, row_len, patches_ref):
    """Gated 3x3 / stride 1 / pad 1 conv on channel-major flattened x.
    x_bf16: (cin, h*w);  w_ref: (2*cout, 9*cin);  masks: (9, h*w) 0/1 bf16."""
    cin, hw = x_bf16.shape
    for kh in range(3):
        for kw in range(3):
            d = (kh - 1) * row_len + (kw - 1)            # src flat offset of this tap
            _store_tap(patches_ref, kh * 3 + kw, x_bf16, d, masks, cin, hw)
    return _gated_matmul(w_ref, b_ref, patches_ref[...])


# ----------------------------------------------------------------------------
# Pallas kernels (one batch element per grid step)
# ----------------------------------------------------------------------------
def _make_same_kernel(row_len):
    """same_shape=True: identity shortcut, stride 1 everywhere."""
    def kernel(x_ref, m_ref, w1_ref, b1_ref, w2_ref, b2_ref, o_ref, patches_ref):
        x32 = x_ref[...]                                  # (Cin, H*W) f32 (aligned read)
        masks = m_ref[...]
        h1 = jnp.maximum(
            _gate_conv3x3_s1(x32.astype(jnp.bfloat16), w1_ref, b1_ref,
                             masks, row_len, patches_ref), 0.0)
        h2 = _gate_conv3x3_s1(h1.astype(jnp.bfloat16), w2_ref, b2_ref,
                              masks, row_len, patches_ref)
        o_ref[...] = jnp.maximum(h2 + x32, 0.0).astype(o_ref.dtype)
    return kernel


def _make_down_kernel(wo):
    """same_shape=False: stride-2 conv1 and gated 1x1/stride-2 shortcut, both
    expressed on the 2x2 polyphase planes of x (plane (a,b)[i,j] = x[2i+a, 2j+b])."""
    def kernel(xph_ref, m1_ref, m2_ref, w1_ref, b1_ref, w2_ref, b2_ref,
               w3_ref, b3_ref, o_ref, patches_ref):
        cin = xph_ref.shape[1]
        hwo = xph_ref.shape[2]
        m1 = m1_ref[...]
        planes = [xph_ref[t].astype(jnp.bfloat16) for t in range(4)]   # (Cin, Ho*Wo) x4

        # ---- GateConv1: 3x3, stride 2, pad 1 (taps read the matching phase plane) ----
        for kh in range(3):
            for kw in range(3):
                a, b = (kh + 1) % 2, (kw + 1) % 2          # input-row/col parity of tap
                d = (-wo if kh == 0 else 0) + (-1 if kw == 0 else 0)
                _store_tap(patches_ref, kh * 3 + kw, planes[2 * a + b], d, m1, cin, hwo)
        h1 = jnp.maximum(_gated_matmul(w1_ref, b1_ref, patches_ref[...]), 0.0)

        # ---- GateConv2: 3x3, stride 1, pad 1 on the (Cmid, Ho*Wo) intermediate ----
        h2 = _gate_conv3x3_s1(h1.astype(jnp.bfloat16), w2_ref, b2_ref,
                              m2_ref[...], wo, patches_ref)

        # ---- GateConv3 shortcut: 1x1, stride 2 == dense matmul on phase (0,0) ----
        h3 = _gated_matmul(w3_ref, b3_ref, planes[0])

        o_ref[...] = jnp.maximum(h2 + h3, 0.0).astype(o_ref.dtype)
    return kernel


# ----------------------------------------------------------------------------
# plain-JAX glue: parameter init, weight flattening, mask tables, pallas_call
# ----------------------------------------------------------------------------
def init_residual_params(key, in_channels, out_channels, same_shape=True,
                         dtype=jnp.float32):
    """Deterministic synthetic parameters (HWIO weight layout, raw 2x channels)."""
    ks = jax.random.split(key, 6)

    def conv_init(kw_key, kb_key, cin, cout_raw, ksz):
        w = 0.1 * jax.random.normal(kw_key, (ksz, ksz, cin, cout_raw), dtype)
        b = 0.1 * jax.random.normal(kb_key, (cout_raw,), dtype)
        return w, b

    p = {}
    p["w1"], p["b1"] = conv_init(ks[0], ks[1], in_channels, 2 * in_channels, 3)
    p["w2"], p["b2"] = conv_init(ks[2], ks[3], in_channels, out_channels, 3)
    if not same_shape:
        p["w3"], p["b3"] = conv_init(ks[4], ks[5], in_channels, out_channels, 1)
    return p


def _flatten_gate_weight(w_hwio, b):
    """(kh,kw,Cin,Craw) HWIO -> (Craw, kh*kw*Cin) bf16 matmul weight (feat rows first,
    gate rows second, matching torch.chunk along the output-channel dim)."""
    kh, kw, cin, craw = w_hwio.shape
    wm = jnp.transpose(w_hwio, (3, 0, 1, 2)).reshape(craw, kh * kw * cin)
    return wm.astype(jnp.bfloat16), b.astype(jnp.float32).reshape(craw, 1)


def _tap_masks(h, w, stride):
    """(9, Ho*Wo) bf16 0/1 validity masks for the 9 taps of a 3x3/pad-1 conv
    (built once in numpy at trace time; no iota/div inside the kernel)."""
    ho, wo = (h - 1) // stride + 1, (w - 1) // stride + 1
    row = np.arange(ho * wo) // wo
    col = np.arange(ho * wo) % wo
    m = []
    for kh in range(3):
        for kw in range(3):
            r = stride * row + kh - 1
            c = stride * col + kw - 1
            m.append((r >= 0) & (r <= h - 1) & (c >= 0) & (c <= w - 1))
    return jnp.asarray(np.stack(m), dtype=jnp.bfloat16)


def residual_forward(params, x_nchw, same_shape=True):
    x = x_nchw.astype(jnp.float32)
    B, Cin, H, W = x.shape
    Cmid = params["b1"].shape[0] // 2
    Cout = params["b2"].shape[0] // 2
    assert Cmid == Cin, "GateConv1 must produce in_channels gated channels"

    w1m, b1m = _flatten_gate_weight(params["w1"], params["b1"])
    w2m, b2m = _flatten_gate_weight(params["w2"], params["b2"])

    def full_spec(a):
        nd = a.ndim
        return pl.BlockSpec(a.shape, lambda b, nd=nd: (0,) * nd)

    if same_shape:
        assert Cout == Cin, (
            f"same_shape residual add requires out_channels == 2*in_channels "
            f"(got Cout={Cout}, Cin={Cin})")
        Ho, Wo = H, W
        HWo = H * W
        x_in = x.reshape(B, Cin, HWo)                     # free reshape of NCHW
        masks = _tap_masks(H, W, stride=1)
        kernel = _make_same_kernel(W)
        args = [x_in, masks, w1m, b1m, w2m, b2m]
        in_specs = [pl.BlockSpec((None, Cin, HWo), lambda b: (b, 0, 0)),
                    full_spec(masks), full_spec(w1m), full_spec(b1m),
                    full_spec(w2m), full_spec(b2m)]
    else:
        assert H % 2 == 0 and W % 2 == 0, "stride-2 path assumes even H, W"
        Ho, Wo = H // 2, W // 2
        HWo = Ho * Wo
        # 2x2 polyphase decomposition of x: plane (a,b) = x[:, :, a::2, b::2]
        phases = jnp.stack([x[:, :, a::2, b::2].reshape(B, Cin, HWo)
                            for a in (0, 1) for b in (0, 1)], axis=1)  # (B,4,Cin,HWo)
        m1 = _tap_masks(H, W, stride=2)                   # conv1 masks on output grid
        m2 = _tap_masks(Ho, Wo, stride=1)                 # conv2 masks
        w3m, b3m = _flatten_gate_weight(params["w3"], params["b3"])
        kernel = _make_down_kernel(Wo)
        args = [phases, m1, m2, w1m, b1m, w2m, b2m, w3m, b3m]
        in_specs = [pl.BlockSpec((None, 4, Cin, HWo), lambda b: (b, 0, 0, 0)),
                    full_spec(m1), full_spec(m2),
                    full_spec(w1m), full_spec(b1m), full_spec(w2m), full_spec(b2m),
                    full_spec(w3m), full_spec(b3m)]

    out_flat = pl.pallas_call(
        kernel,
        out_shape=jax.ShapeDtypeStruct((B, Cout, HWo), jnp.float32),
        grid=(B,),
        in_specs=in_specs,
        out_specs=pl.BlockSpec((None, Cout, HWo), lambda b: (b, 0, 0)),
        scratch_shapes=[pltpu.VMEM((9 * Cin, HWo), jnp.bfloat16)],   # im2col patches
        compiler_params=pltpu.CompilerParams(dimension_semantics=("parallel",)),
    )(*args)

    return out_flat.reshape(B, Cout, Ho, Wo)              # already NCHW


# ----------------------------------------------------------------------------
# pure-JAX reference (for verification only)
# ----------------------------------------------------------------------------
def _gate_conv_ref(x, w, b, stride, padding):
    y = jax.lax.conv_general_dilated(
        x, w, window_strides=(stride, stride),
        padding=((padding, padding), (padding, padding)),
        dimension_numbers=("NCHW", "HWIO", "NCHW"),
        precision=jax.lax.Precision.HIGHEST)
    y = y + b.reshape(1, -1, 1, 1)
    c = y.shape[1] // 2
    return y[:, :c] * jax.nn.sigmoid(y[:, c:])


def residual_ref(params, x_nchw, same_shape=True):
    x = x_nchw.astype(jnp.float32)
    stride = 1 if same_shape else 2
    out = jax.nn.relu(_gate_conv_ref(x, params["w1"], params["b1"], stride, 1))
    out = _gate_conv_ref(out, params["w2"], params["b2"], 1, 1)
    sc = x if same_shape else _gate_conv_ref(x, params["w3"], params["b3"], stride, 0)
    return jax.nn.relu(out + sc)


if __name__ == "__main__":
    key = jax.random.PRNGKey(0)
    kx, kp1, kp2 = jax.random.split(key, 3)

    B, in_c, out_c, H, W = 2, 4, 8, 16, 16
    x = jax.random.normal(kx, (B, in_c, H, W), jnp.float32)          # NCHW input

    # --- same_shape=True (identity shortcut) ---
    p1 = init_residual_params(kp1, in_c, out_c, same_shape=True)
    y1 = jax.block_until_ready(residual_forward(p1, x, same_shape=True))
    r1 = residual_ref(p1, x, same_shape=True)
    assert y1.shape == (B, out_c // 2, H, W), y1.shape
    e1 = float(jnp.max(jnp.abs(y1 - r1)))
    # bf16 MXU operands vs full-f32 reference -> tolerance a bit above 1e-2
    assert e1 < 5e-2, f"same_shape max abs err {e1}"

    # --- same_shape=False (stride-2 conv1 + gated 1x1 shortcut) ---
    p2 = init_residual_params(kp2, in_c, out_c, same_shape=False)
    y2 = jax.block_until_ready(residual_forward(p2, x, same_shape=False))
    r2 = residual_ref(p2, x, same_shape=False)
    assert y2.shape == (B, out_c // 2, H // 2, W // 2), y2.shape
    e2 = float(jnp.max(jnp.abs(y2 - r2)))
    assert e2 < 5e-2, f"downsample max abs err {e2}"

    print("KERNEL_OK")
</pallas_src>

<mosaic_0001>
module attributes {stable_mosaic.version = 11 : i64} {
  func.func @kernel(%arg0: i32, %arg1: memref<1x4x256xf32, #tpu.memory_space<vmem>>, %arg2: memref<9x256xbf16, #tpu.memory_space<vmem>>, %arg3: memref<8x36xbf16, #tpu.memory_space<vmem>>, %arg4: memref<8x1xf32, #tpu.memory_space<vmem>>, %arg5: memref<8x36xbf16, #tpu.memory_space<vmem>>, %arg6: memref<8x1xf32, #tpu.memory_space<vmem>>, %arg7: memref<1x4x256xf32, #tpu.memory_space<vmem>>, %arg8: memref<36x256xbf16, #tpu.memory_space<vmem>>) attributes {dimension_semantics = [#tpu.dimension_semantics<parallel>], iteration_bounds = array<i64: 2>, scalar_prefetch = 0 : i64, scratch_operands = 1 : i64, tpu.core_type = #tpu.core_type<tc>, window_params = [{transform_indices = @transform_0, window_bounds = array<i64: 1, 4, 256>}, {pipeline_mode = #tpu.pipeline_mode<synchronous>, transform_indices = @transform_1, window_bounds = array<i64: 9, 256>}, {pipeline_mode = #tpu.pipeline_mode<synchronous>, transform_indices = @transform_2, window_bounds = array<i64: 8, 36>}, {pipeline_mode = #tpu.pipeline_mode<synchronous>, transform_indices = @transform_3, window_bounds = array<i64: 8, 1>}, {pipeline_mode = #tpu.pipeline_mode<synchronous>, transform_indices = @transform_4, window_bounds = array<i64: 8, 36>}, {pipeline_mode = #tpu.pipeline_mode<synchronous>, transform_indices = @transform_5, window_bounds = array<i64: 8, 1>}, {transform_indices = @transform_6, window_bounds = array<i64: 1, 4, 256>}]} {
    %c0 = arith.constant 0 : index
    %c0_0 = arith.constant 0 : index
    %c0_1 = arith.constant 0 : index
    %0 = vector.load %arg1[%c0, %c0_0, %c0_1] : memref<1x4x256xf32, #tpu.memory_space<vmem>>, vector<1x4x256xf32>
    %1 = vector.shape_cast %0 : vector<1x4x256xf32> to vector<4x256xf32>
    %c0_2 = arith.constant 0 : index
    %c0_3 = arith.constant 0 : index
    %2 = vector.load %arg2[%c0_2, %c0_3] : memref<9x256xbf16, #tpu.memory_space<vmem>>, vector<9x256xbf16>
    %3 = arith.truncf %1 : vector<4x256xf32> to vector<4x256xbf16>
    %cst = arith.constant 0.000000e+00 : bf16
    %4 = vector.broadcast %cst : bf16 to vector<4x17xbf16>
    %c0_4 = arith.constant 0 : index
    %c0_5 = arith.constant 0 : index
    %5 = vector.load %arg8[%c0_4, %c0_5] : memref<36x256xbf16, #tpu.memory_space<vmem>>, vector<4x17xbf16>
    tpu.vector_store %arg8[%c0_4, %c0_5], %4 {strides = array<i32>} : memref<36x256xbf16, #tpu.memory_space<vmem>>, vector<4x17xbf16>,
    %6 = vector.extract_strided_slice %3 {offsets = [0, 0], sizes = [4, 239], strides = [1, 1]} : vector<4x256xbf16> to vector<4x239xbf16>
    %7 = vector.extract_strided_slice %2 {offsets = [0, 17], sizes = [1, 239], strides = [1, 1]} : vector<9x256xbf16> to vector<1x239xbf16>
    %8 = vector.broadcast %7 : vector<1x239xbf16> to vector<4x239xbf16>
    %9 = arith.mulf %6, %8 : vector<4x239xbf16>
    %c0_6 = arith.constant 0 : index
    %c17 = arith.constant 17 : index
    %10 = vector.load %arg8[%c0_6, %c17] : memref<36x256xbf16, #tpu.memory_space<vmem>>, vector<4x239xbf16>
    tpu.vector_store %arg8[%c0_6, %c17], %9 {strides = array<i32>} : memref<36x256xbf16, #tpu.memory_space<vmem>>, vector<4x239xbf16>,
    %cst_7 = arith.constant 0.000000e+00 : bf16
    %11 = vector.broadcast %cst_7 : bf16 to vector<4x16xbf16>
    %c4 = arith.constant 4 : index
    %c0_8 = arith.constant 0 : index
    %12 = vector.load %arg8[%c4, %c0_8] : memref<36x256xbf16, #tpu.memory_space<vmem>>, vector<4x16xbf16>
    tpu.vector_store %arg8[%c4, %c0_8], %11 {strides = array<i32>} : memref<36x256xbf16, #tpu.memory_space<vmem>>, vector<4x16xbf16>,
    %13 = vector.extract_strided_slice %3 {offsets = [0, 0], sizes = [4, 240], strides = [1, 1]} : vector<4x256xbf16> to vector<4x240xbf16>
    %14 = vector.extract_strided_slice %2 {offsets = [1, 16], sizes = [1, 240], strides = [1, 1]} : vector<9x256xbf16> to vector<1x240xbf16>
    %15 = vector.broadcast %14 : vector<1x240xbf16> to vector<4x240xbf16>
    %16 = arith.mulf %13, %15 : vector<4x240xbf16>
    %c4_9 = arith.constant 4 : index
    %c16 = arith.constant 16 : index
    %17 = vector.load %arg8[%c4_9, %c16] : memref<36x256xbf16, #tpu.memory_space<vmem>>, vector<4x240xbf16>
    tpu.vector_store %arg8[%c4_9, %c16], %16 {strides = array<i32>} : memref<36x256xbf16, #tpu.memory_space<vmem>>, vector<4x240xbf16>,
    %cst_10 = arith.constant 0.000000e+00 : bf16
    %18 = vector.broadcast %cst_10 : bf16 to vector<4x15xbf16>
    %c8 = arith.constant 8 : index
    %c0_11 = arith.constant 0 : index
    %19 = vector.load %arg8[%c8, %c0_11] : memref<36x256xbf16, #tpu.memory_space<vmem>>, vector<4x15xbf16>
    tpu.vector_store %arg8[%c8, %c0_11], %18 {strides = array<i32>} : memref<36x256xbf16, #tpu.memory_space<vmem>>, vector<4x15xbf16>,
    %20 = vector.extract_strided_slice %3 {offsets = [0, 0], sizes = [4, 241], strides = [1, 1]} : vector<4x256xbf16> to vector<4x241xbf16>
    %21 = vector.extract_strided_slice %2 {offsets = [2, 15], sizes = [1, 241], strides = [1, 1]} : vector<9x256xbf16> to vector<1x241xbf16>
    %22 = vector.broadcast %21 : vector<1x241xbf16> to vector<4x241xbf16>
    %23 = arith.mulf %20, %22 : vector<4x241xbf16>
    %c8_12 = arith.constant 8 : index
    %c15 = arith.constant 15 : index
    %24 = vector.load %arg8[%c8_12, %c15] : memref<36x256xbf16, #tpu.memory_space<vmem>>, vector<4x241xbf16>
    tpu.vector_store %arg8[%c8_12, %c15], %23 {strides = array<i32>} : memref<36x256xbf16, #tpu.memory_space<vmem>>, vector<4x241xbf16>,
    %cst_13 = arith.constant 0.000000e+00 : bf16
    %25 = vector.broadcast %cst_13 : bf16 to vector<4x1xbf16>
    %c12 = arith.constant 12 : index
    %c0_14 = arith.constant 0 : index
    %26 = vector.load %arg8[%c12, %c0_14] : memref<36x256xbf16, #tpu.memory_space<vmem>>, vector<4x1xbf16>
    tpu.vector_store %arg8[%c12, %c0_14], %25 {strides = array<i32>} : memref<36x256xbf16, #tpu.memory_space<vmem>>, vector<4x1xbf16>,
    %27 = vector.extract_strided_slice %3 {offsets = [0, 0], sizes = [4, 255], strides = [1, 1]} : vector<4x256xbf16> to vector<4x255xbf16>
    %28 = vector.extract_strided_slice %2 {offsets = [3, 1], sizes = [1, 255], strides = [1, 1]} : vector<9x256xbf16> to vector<1x255xbf16>
    %29 = vector.broadcast %28 : vector<1x255xbf16> to vector<4x255xbf16>
    %30 = arith.mulf %27, %29 : vector<4x255xbf16>
    %c12_15 = arith.constant 12 : index
    %c1 = arith.constant 1 : index
    %31 = vector.load %arg8[%c12_15, %c1] : memref<36x256xbf16, #tpu.memory_space<vmem>>, vector<4x255xbf16>
    tpu.vector_store %arg8[%c12_15, %c1], %30 {strides = array<i32>} : memref<36x256xbf16, #tpu.memory_space<vmem>>, vector<4x255xbf16>,
    %32 = vector.extract_strided_slice %2 {offsets = [4, 0], sizes = [1, 256], strides = [1, 1]} : vector<9x256xbf16> to vector<1x256xbf16>
    %33 = vector.broadcast %32 : vector<1x256xbf16> to vector<4x256xbf16>
    %34 = arith.mulf %3, %33 : vector<4x256xbf16>
    %c16_16 = arith.constant 16 : index
    %c0_17 = arith.constant 0 : index
    %35 = vector.load %arg8[%c16_16, %c0_17] : memref<36x256xbf16, #tpu.memory_space<vmem>>, vector<4x256xbf16>
    tpu.vector_store %arg8[%c16_16, %c0_17], %34 {strides = array<i32>} : memref<36x256xbf16, #tpu.memory_space<vmem>>, vector<4x256xbf16>,
    %cst_18 = arith.constant 0.000000e+00 : bf16
    %36 = vector.broadcast %cst_18 : bf16 to vector<4x1xbf16>
    %c20 = arith.constant 20 : index
    %c255 = arith.constant 255 : index
    %37 = vector.load %arg8[%c20, %c255] : memref<36x256xbf16, #tpu.memory_space<vmem>>, vector<4x1xbf16>
    tpu.vector_store %arg8[%c20, %c255], %36 {strides = array<i32>} : memref<36x256xbf16, #tpu.memory_space<vmem>>, vector<4x1xbf16>,
    %38 = vector.extract_strided_slice %3 {offsets = [0, 1], sizes = [4, 255], strides = [1, 1]} : vector<4x256xbf16> to vector<4x255xbf16>
    %39 = vector.extract_strided_slice %2 {offsets = [5, 0], sizes = [1, 255], strides = [1, 1]} : vector<9x256xbf16> to vector<1x255xbf16>
    %40 = vector.broadcast %39 : vector<1x255xbf16> to vector<4x255xbf16>
    %41 = arith.mulf %38, %40 : vector<4x255xbf16>
    %c20_19 = arith.constant 20 : index
    %c0_20 = arith.constant 0 : index
    %42 = vector.load %arg8[%c20_19, %c0_20] : memref<36x256xbf16, #tpu.memory_space<vmem>>, vector<4x255xbf16>
    tpu.vector_store %arg8[%c20_19, %c0_20], %41 {strides = array<i32>} : memref<36x256xbf16, #tpu.memory_space<vmem>>, vector<4x255xbf16>,
    %cst_21 = arith.constant 0.000000e+00 : bf16
    %43 = vector.broadcast %cst_21 : bf16 to vector<4x15xbf16>
    %c24 = arith.constant 24 : index
    %c241 = arith.constant 241 : index
    %44 = vector.load %arg8[%c24, %c241] : memref<36x256xbf16, #tpu.memory_space<vmem>>, vector<4x15xbf16>
    tpu.vector_store %arg8[%c24, %c241], %43 {strides = array<i32>} : memref<36x256xbf16, #tpu.memory_space<vmem>>, vector<4x15xbf16>,
    %45 = vector.extract_strided_slice %3 {offsets = [0, 15], sizes = [4, 241], strides = [1, 1]} : vector<4x256xbf16> to vector<4x241xbf16>
    %46 = vector.extract_strided_slice %2 {offsets = [6, 0], sizes = [1, 241], strides = [1, 1]} : vector<9x256xbf16> to vector<1x241xbf16>
    %47 = vector.broadcast %46 : vector<1x241xbf16> to vector<4x241xbf16>
    %48 = arith.mulf %45, %47 : vector<4x241xbf16>
    %c24_22 = arith.constant 24 : index
    %c0_23 = arith.constant 0 : index
    %49 = vector.load %arg8[%c24_22, %c0_23] : memref<36x256xbf16, #tpu.memory_space<vmem>>, vector<4x241xbf16>
    tpu.vector_store %arg8[%c24_22, %c0_23], %48 {strides = array<i32>} : memref<36x256xbf16, #tpu.memory_space<vmem>>, vector<4x241xbf16>,
    %cst_24 = arith.constant 0.000000e+00 : bf16
    %50 = vector.broadcast %cst_24 : bf16 to vector<4x16xbf16>
    %c28 = arith.constant 28 : index
    %c240 = arith.constant 240 : index
    %51 = vector.load %arg8[%c28, %c240] : memref<36x256xbf16, #tpu.memory_space<vmem>>, vector<4x16xbf16>
    tpu.vector_store %arg8[%c28, %c240], %50 {strides = array<i32>} : memref<36x256xbf16, #tpu.memory_space<vmem>>, vector<4x16xbf16>,
    %52 = vector.extract_strided_slice %3 {offsets = [0, 16], sizes = [4, 240], strides = [1, 1]} : vector<4x256xbf16> to vector<4x240xbf16>
    %53 = vector.extract_strided_slice %2 {offsets = [7, 0], sizes = [1, 240], strides = [1, 1]} : vector<9x256xbf16> to vector<1x240xbf16>
    %54 = vector.broadcast %53 : vector<1x240xbf16> to vector<4x240xbf16>
    %55 = arith.mulf %52, %54 : vector<4x240xbf16>
    %c28_25 = arith.constant 28 : index
    %c0_26 = arith.constant 0 : index
    %56 = vector.load %arg8[%c28_25, %c0_26] : memref<36x256xbf16, #tpu.memory_space<vmem>>, vector<4x240xbf16>
    tpu.vector_store %arg8[%c28_25, %c0_26], %55 {strides = array<i32>} : memref<36x256xbf16, #tpu.memory_space<vmem>>, vector<4x240xbf16>,
    %cst_27 = arith.constant 0.000000e+00 : bf16
    %57 = vector.broadcast %cst_27 : bf16 to vector<4x17xbf16>
    %c32 = arith.constant 32 : index
    %c239 = arith.constant 239 : index
    %58 = vector.load %arg8[%c32, %c239] : memref<36x256xbf16, #tpu.memory_space<vmem>>, vector<4x17xbf16>
    tpu.vector_store %arg8[%c32, %c239], %57 {strides = array<i32>} : memref<36x256xbf16, #tpu.memory_space<vmem>>, vector<4x17xbf16>,
    %59 = vector.extract_strided_slice %3 {offsets = [0, 17], sizes = [4, 239], strides = [1, 1]} : vector<4x256xbf16> to vector<4x239xbf16>
    %60 = vector.extract_strided_slice %2 {offsets = [8, 0], sizes = [1, 239], strides = [1, 1]} : vector<9x256xbf16> to vector<1x239xbf16>
    %61 = vector.broadcast %60 : vector<1x239xbf16> to vector<4x239xbf16>
    %62 = arith.mulf %59, %61 : vector<4x239xbf16>
    %c32_28 = arith.constant 32 : index
    %c0_29 = arith.constant 0 : index
    %63 = vector.load %arg8[%c32_28, %c0_29] : memref<36x256xbf16, #tpu.memory_space<vmem>>, vector<4x239xbf16>
    tpu.vector_store %arg8[%c32_28, %c0_29], %62 {strides = array<i32>} : memref<36x256xbf16, #tpu.memory_space<vmem>>, vector<4x239xbf16>,
    %c0_30 = arith.constant 0 : index
    %c0_31 = arith.constant 0 : index
    %64 = vector.load %arg8[%c0_30, %c0_31] : memref<36x256xbf16, #tpu.memory_space<vmem>>, vector<36x256xbf16>
    %c0_32 = arith.constant 0 : index
    %c0_33 = arith.constant 0 : index
    %65 = vector.load %arg3[%c0_32, %c0_33] : memref<8x36xbf16, #tpu.memory_space<vmem>>, vector<8x36xbf16>
    %cst_34 = arith.constant dense<0.000000e+00> : vector<8x256xf32>
    %66 = tpu.matmul %65, %64, %cst_34 {dimension_numbers = #tpu.dot_dimension_numbers<[1], [0], [0], [1], [0, 0, 1, 1], [], []>} : vector<8x36xbf16>, vector<36x256xbf16>, vector<8x256xf32> -> vector<8x256xf32>
    %c0_35 = arith.constant 0 : index
    %c0_36 = arith.constant 0 : index
    %67 = vector.load %arg4[%c0_35, %c0_36] : memref<8x1xf32, #tpu.memory_space<vmem>>, vector<8x1xf32>
    %68 = vector.broadcast %67 : vector<8x1xf32> to vector<8x256xf32>
    %69 = arith.addf %66, %68 : vector<8x256xf32>
    %70 = vector.extract_strided_slice %69 {offsets = [0, 0], sizes = [4, 256], strides = [1, 1]} : vector<8x256xf32> to vector<4x256xf32>
    %71 = vector.extract_strided_slice %69 {offsets = [4, 0], sizes = [4, 256], strides = [1, 1]} : vector<8x256xf32> to vector<4x256xf32>
    %72 = arith.negf %71 : vector<4x256xf32>
    %73 = math.exp %72 : vector<4x256xf32>
    %cst_37 = arith.constant 1.000000e+00 : f32
    %74 = vector.broadcast %cst_37 : f32 to vector<4x256xf32>
    %75 = arith.addf %74, %73 : vector<4x256xf32>
    %76 = arith.divf %74, %75 : vector<4x256xf32>
    %77 = arith.mulf %70, %76 : vector<4x256xf32>
    %cst_38 = arith.constant 0.000000e+00 : f32
    %78 = vector.broadcast %cst_38 : f32 to vector<4x256xf32>
    %79 = arith.maximumf %77, %78 : vector<4x256xf32>
    %80 = arith.truncf %79 : vector<4x256xf32> to vector<4x256xbf16>
    %cst_39 = arith.constant 0.000000e+00 : bf16
    %81 = vector.broadcast %cst_39 : bf16 to vector<4x17xbf16>
    %c0_40 = arith.constant 0 : index
    %c0_41 = arith.constant 0 : index
    %82 = vector.load %arg8[%c0_40, %c0_41] : memref<36x256xbf16, #tpu.memory_space<vmem>>, vector<4x17xbf16>
    tpu.vector_store %arg8[%c0_40, %c0_41], %81 {strides = array<i32>} : memref<36x256xbf16, #tpu.memory_space<vmem>>, vector<4x17xbf16>,
    %83 = vector.extract_strided_slice %80 {offsets = [0, 0], sizes = [4, 239], strides = [1, 1]} : vector<4x256xbf16> to vector<4x239xbf16>
    %84 = vector.extract_strided_slice %2 {offsets = [0, 17], sizes = [1, 239], strides = [1, 1]} : vector<9x256xbf16> to vector<1x239xbf16>
    %85 = vector.broadcast %84 : vector<1x239xbf16> to vector<4x239xbf16>
    %86 = arith.mulf %83, %85 : vector<4x239xbf16>
    %c0_42 = arith.constant 0 : index
    %c17_43 = arith.constant 17 : index
    %87 = vector.load %arg8[%c0_42, %c17_43] : memref<36x256xbf16, #tpu.memory_space<vmem>>, vector<4x239xbf16>
    tpu.vector_store %arg8[%c0_42, %c17_43], %86 {strides = array<i32>} : memref<36x256xbf16, #tpu.memory_space<vmem>>, vector<4x239xbf16>,
    %cst_44 = arith.constant 0.000000e+00 : bf16
    %88 = vector.broadcast %cst_44 : bf16 to vector<4x16xbf16>
    %c4_45 = arith.constant 4 : index
    %c0_46 = arith.constant 0 : index
    %89 = vector.load %arg8[%c4_45, %c0_46] : memref<36x256xbf16, #tpu.memory_space<vmem>>, vector<4x16xbf16>
    tpu.vector_store %arg8[%c4_45, %c0_46], %88 {strides = array<i32>} : memref<36x256xbf16, #tpu.memory_space<vmem>>, vector<4x16xbf16>,
    %90 = vector.extract_strided_slice %80 {offsets = [0, 0], sizes = [4, 240], strides = [1, 1]} : vector<4x256xbf16> to vector<4x240xbf16>
    %91 = vector.extract_strided_slice %2 {offsets = [1, 16], sizes = [1, 240], strides = [1, 1]} : vector<9x256xbf16> to vector<1x240xbf16>
    %92 = vector.broadcast %91 : vector<1x240xbf16> to vector<4x240xbf16>
    %93 = arith.mulf %90, %92 : vector<4x240xbf16>
    %c4_47 = arith.constant 4 : index
    %c16_48 = arith.constant 16 : index
    %94 = vector.load %arg8[%c4_47, %c16_48] : memref<36x256xbf16, #tpu.memory_space<vmem>>, vector<4x240xbf16>
    tpu.vector_store %arg8[%c4_47, %c16_48], %93 {strides = array<i32>} : memref<36x256xbf16, #tpu.memory_space<vmem>>, vector<4x240xbf16>,
    %cst_49 = arith.constant 0.000000e+00 : bf16
    %95 = vector.broadcast %cst_49 : bf16 to vector<4x15xbf16>
    %c8_50 = arith.constant 8 : index
    %c0_51 = arith.constant 0 : index
    %96 = vector.load %arg8[%c8_50, %c0_51] : memref<36x256xbf16, #tpu.memory_space<vmem>>, vector<4x15xbf16>
    tpu.vector_store %arg8[%c8_50, %c0_51], %95 {strides = array<i32>} : memref<36x256xbf16, #tpu.memory_space<vmem>>, vector<4x15xbf16>,
    %97 = vector.extract_strided_slice %80 {offsets = [0, 0], sizes = [4, 241], strides = [1, 1]} : vector<4x256xbf16> to vector<4x241xbf16>
    %98 = vector.extract_strided_slice %2 {offsets = [2, 15], sizes = [1, 241], strides = [1, 1]} : vector<9x256xbf16> to vector<1x241xbf16>
    %99 = vector.broadcast %98 : vector<1x241xbf16> to vector<4x241xbf16>
    %100 = arith.mulf %97, %99 : vector<4x241xbf16>
    %c8_52 = arith.constant 8 : index
    %c15_53 = arith.constant 15 : index
    %101 = vector.load %arg8[%c8_52, %c15_53] : memref<36x256xbf16, #tpu.memory_space<vmem>>, vector<4x241xbf16>
    tpu.vector_store %arg8[%c8_52, %c15_53], %100 {strides = array<i32>} : memref<36x256xbf16, #tpu.memory_space<vmem>>, vector<4x241xbf16>,
    %cst_54 = arith.constant 0.000000e+00 : bf16
    %102 = vector.broadcast %cst_54 : bf16 to vector<4x1xbf16>
    %c12_55 = arith.constant 12 : index
    %c0_56 = arith.constant 0 : index
    %103 = vector.load %arg8[%c12_55, %c0_56] : memref<36x256xbf16, #tpu.memory_space<vmem>>, vector<4x1xbf16>
    tpu.vector_store %arg8[%c12_55, %c0_56], %102 {strides = array<i32>} : memref<36x256xbf16, #tpu.memory_space<vmem>>, vector<4x1xbf16>,
    %104 = vector.extract_strided_slice %80 {offsets = [0, 0], sizes = [4, 255], strides = [1, 1]} : vector<4x256xbf16> to vector<4x255xbf16>
    %105 = vector.extract_strided_slice %2 {offsets = [3, 1], sizes = [1, 255], strides = [1, 1]} : vector<9x256xbf16> to vector<1x255xbf16>
    %106 = vector.broadcast %105 : vector<1x255xbf16> to vector<4x255xbf16>
    %107 = arith.mulf %104, %106 : vector<4x255xbf16>
    %c12_57 = arith.constant 12 : index
    %c1_58 = arith.constant 1 : index
    %108 = vector.load %arg8[%c12_57, %c1_58] : memref<36x256xbf16, #tpu.memory_space<vmem>>, vector<4x255xbf16>
    tpu.vector_store %arg8[%c12_57, %c1_58], %107 {strides = array<i32>} : memref<36x256xbf16, #tpu.memory_space<vmem>>, vector<4x255xbf16>,
    %109 = vector.extract_strided_slice %2 {offsets = [4, 0], sizes = [1, 256], strides = [1, 1]} : vector<9x256xbf16> to vector<1x256xbf16>
    %110 = vector.broadcast %109 : vector<1x256xbf16> to vector<4x256xbf16>
    %111 = arith.mulf %80, %110 : vector<4x256xbf16>
    %c16_59 = arith.constant 16 : index
    %c0_60 = arith.constant 0 : index
    %112 = vector.load %arg8[%c16_59, %c0_60] : memref<36x256xbf16, #tpu.memory_space<vmem>>, vector<4x256xbf16>
    tpu.vector_store %arg8[%c16_59, %c0_60], %111 {strides = array<i32>} : memref<36x256xbf16, #tpu.memory_space<vmem>>, vector<4x256xbf16>,
    %cst_61 = arith.constant 0.000000e+00 : bf16
    %113 = vector.broadcast %cst_61 : bf16 to vector<4x1xbf16>
    %c20_62 = arith.constant 20 : index
    %c255_63 = arith.constant 255 : index
    %114 = vector.load %arg8[%c20_62, %c255_63] : memref<36x256xbf16, #tpu.memory_space<vmem>>, vector<4x1xbf16>
    tpu.vector_store %arg8[%c20_62, %c255_63], %113 {strides = array<i32>} : memref<36x256xbf16, #tpu.memory_space<vmem>>, vector<4x1xbf16>,
    %115 = vector.extract_strided_slice %80 {offsets = [0, 1], sizes = [4, 255], strides = [1, 1]} : vector<4x256xbf16> to vector<4x255xbf16>
    %116 = vector.extract_strided_slice %2 {offsets = [5, 0], sizes = [1, 255], strides = [1, 1]} : vector<9x256xbf16> to vector<1x255xbf16>
    %117 = vector.broadcast %116 : vector<1x255xbf16> to vector<4x255xbf16>
    %118 = arith.mulf %115, %117 : vector<4x255xbf16>
    %c20_64 = arith.constant 20 : index
    %c0_65 = arith.constant 0 : index
    %119 = vector.load %arg8[%c20_64, %c0_65] : memref<36x256xbf16, #tpu.memory_space<vmem>>, vector<4x255xbf16>
    tpu.vector_store %arg8[%c20_64, %c0_65], %118 {strides = array<i32>} : memref<36x256xbf16, #tpu.memory_space<vmem>>, vector<4x255xbf16>,
    %cst_66 = arith.constant 0.000000e+00 : bf16
    %120 = vector.broadcast %cst_66 : bf16 to vector<4x15xbf16>
    %c24_67 = arith.constant 24 : index
    %c241_68 = arith.constant 241 : index
    %121 = vector.load %arg8[%c24_67, %c241_68] : memref<36x256xbf16, #tpu.memory_space<vmem>>, vector<4x15xbf16>
    tpu.vector_store %arg8[%c24_67, %c241_68], %120 {strides = array<i32>} : memref<36x256xbf16, #tpu.memory_space<vmem>>, vector<4x15xbf16>,
    %122 = vector.extract_strided_slice %80 {offsets = [0, 15], sizes = [4, 241], strides = [1, 1]} : vector<4x256xbf16> to vector<4x241xbf16>
    %123 = vector.extract_strided_slice %2 {offsets = [6, 0], sizes = [1, 241], strides = [1, 1]} : vector<9x256xbf16> to vector<1x241xbf16>
    %124 = vector.broadcast %123 : vector<1x241xbf16> to vector<4x241xbf16>
    %125 = arith.mulf %122, %124 : vector<4x241xbf16>
    %c24_69 = arith.constant 24 : index
    %c0_70 = arith.constant 0 : index
    %126 = vector.load %arg8[%c24_69, %c0_70] : memref<36x256xbf16, #tpu.memory_space<vmem>>, vector<4x241xbf16>
    tpu.vector_store %arg8[%c24_69, %c0_70], %125 {strides = array<i32>} : memref<36x256xbf16, #tpu.memory_space<vmem>>, vector<4x241xbf16>,
    %cst_71 = arith.constant 0.000000e+00 : bf16
    %127 = vector.broadcast %cst_71 : bf16 to vector<4x16xbf16>
    %c28_72 = arith.constant 28 : index
    %c240_73 = arith.constant 240 : index
    %128 = vector.load %arg8[%c28_72, %c240_73] : memref<36x256xbf16, #tpu.memory_space<vmem>>, vector<4x16xbf16>
    tpu.vector_store %arg8[%c28_72, %c240_73], %127 {strides = array<i32>} : memref<36x256xbf16, #tpu.memory_space<vmem>>, vector<4x16xbf16>,
    %129 = vector.extract_strided_slice %80 {offsets = [0, 16], sizes = [4, 240], strides = [1, 1]} : vector<4x256xbf16> to vector<4x240xbf16>
    %130 = vector.extract_strided_slice %2 {offsets = [7, 0], sizes = [1, 240], strides = [1, 1]} : vector<9x256xbf16> to vector<1x240xbf16>
    %131 = vector.broadcast %130 : vector<1x240xbf16> to vector<4x240xbf16>
    %132 = arith.mulf %129, %131 : vector<4x240xbf16>
    %c28_74 = arith.constant 28 : index
    %c0_75 = arith.constant 0 : index
    %133 = vector.load %arg8[%c28_74, %c0_75] : memref<36x256xbf16, #tpu.memory_space<vmem>>, vector<4x240xbf16>
    tpu.vector_store %arg8[%c28_74, %c0_75], %132 {strides = array<i32>} : memref<36x256xbf16, #tpu.memory_space<vmem>>, vector<4x240xbf16>,
    %cst_76 = arith.constant 0.000000e+00 : bf16
    %134 = vector.broadcast %cst_76 : bf16 to vector<4x17xbf16>
    %c32_77 = arith.constant 32 : index
    %c239_78 = arith.constant 239 : index
    %135 = vector.load %arg8[%c32_77, %c239_78] : memref<36x256xbf16, #tpu.memory_space<vmem>>, vector<4x17xbf16>
    tpu.vector_store %arg8[%c32_77, %c239_78], %134 {strides = array<i32>} : memref<36x256xbf16, #tpu.memory_space<vmem>>, vector<4x17xbf16>,
    %136 = vector.extract_strided_slice %80 {offsets = [0, 17], sizes = [4, 239], strides = [1, 1]} : vector<4x256xbf16> to vector<4x239xbf16>
    %137 = vector.extract_strided_slice %2 {offsets = [8, 0], sizes = [1, 239], strides = [1, 1]} : vector<9x256xbf16> to vector<1x239xbf16>
    %138 = vector.broadcast %137 : vector<1x239xbf16> to vector<4x239xbf16>
    %139 = arith.mulf %136, %138 : vector<4x239xbf16>
    %c32_79 = arith.constant 32 : index
    %c0_80 = arith.constant 0 : index
    %140 = vector.load %arg8[%c32_79, %c0_80] : memref<36x256xbf16, #tpu.memory_space<vmem>>, vector<4x239xbf16>
    tpu.vector_store %arg8[%c32_79, %c0_80], %139 {strides = array<i32>} : memref<36x256xbf16, #tpu.memory_space<vmem>>, vector<4x239xbf16>,
    %c0_81 = arith.constant 0 : index
    %c0_82 = arith.constant 0 : index
    %141 = vector.load %arg8[%c0_81, %c0_82] : memref<36x256xbf16, #tpu.memory_space<vmem>>, vector<36x256xbf16>
    %c0_83 = arith.constant 0 : index
    %c0_84 = arith.constant 0 : index
    %142 = vector.load %arg5[%c0_83, %c0_84] : memref<8x36xbf16, #tpu.memory_space<vmem>>, vector<8x36xbf16>
    %cst_85 = arith.constant dense<0.000000e+00> : vector<8x256xf32>
    %143 = tpu.matmul %142, %141, %cst_85 {dimension_numbers = #tpu.dot_dimension_numbers<[1], [0], [0], [1], [0, 0, 1, 1], [], []>} : vector<8x36xbf16>, vector<36x256xbf16>, vector<8x256xf32> -> vector<8x256xf32>
    %c0_86 = arith.constant 0 : index
    %c0_87 = arith.constant 0 : index
    %144 = vector.load %arg6[%c0_86, %c0_87] : memref<8x1xf32, #tpu.memory_space<vmem>>, vector<8x1xf32>
    %145 = vector.broadcast %144 : vector<8x1xf32> to vector<8x256xf32>
    %146 = arith.addf %143, %145 : vector<8x256xf32>
    %147 = vector.extract_strided_slice %146 {offsets = [0, 0], sizes = [4, 256], strides = [1, 1]} : vector<8x256xf32> to vector<4x256xf32>
    %148 = vector.extract_strided_slice %146 {offsets = [4, 0], sizes = [4, 256], strides = [1, 1]} : vector<8x256xf32> to vector<4x256xf32>
    %149 = arith.negf %148 : vector<4x256xf32>
    %150 = math.exp %149 : vector<4x256xf32>
    %cst_88 = arith.constant 1.000000e+00 : f32
    %151 = vector.broadcast %cst_88 : f32 to vector<4x256xf32>
    %152 = arith.addf %151, %150 : vector<4x256xf32>
    %153 = arith.divf %151, %152 : vector<4x256xf32>
    %154 = arith.mulf %147, %153 : vector<4x256xf32>
    %155 = arith.addf %154, %1 : vector<4x256xf32>
    %cst_89 = arith.constant 0.000000e+00 : f32
    %156 = vector.broadcast %cst_89 : f32 to vector<4x256xf32>
    %157 = arith.maximumf %155, %156 : vector<4x256xf32>
    %c0_90 = arith.constant 0 : index
    %c0_91 = arith.constant 0 : index
    %c0_92 = arith.constant 0 : index
    %158 = vector.load %arg7[%c0_90, %c0_91, %c0_92] : memref<1x4x256xf32, #tpu.memory_space<vmem>>, vector<1x4x256xf32>
    %159 = vector.shape_cast %158 : vector<1x4x256xf32> to vector<4x256xf32>
    %160 = vector.shape_cast %157 : vector<4x256xf32> to vector<1x4x256xf32>
    tpu.vector_store %arg7[%c0_90, %c0_91, %c0_92], %160 {strides = array<i32>} : memref<1x4x256xf32, #tpu.memory_space<vmem>>, vector<1x4x256xf32>,
    return
  }
  func.func @transform_0(%arg0: i32) -> (i32, i32, i32) {
    %c0_i32 = arith.constant 0 : i32
    %c0_i32_0 = arith.constant 0 : i32
    %c0_i32_1 = arith.constant 0 : i32
    return %arg0, %c0_i32, %c0_i32_0 : i32, i32, i32
  }
  func.func @transform_1(%arg0: i32) -> (i32, i32) {
    %c0_i32 = arith.constant 0 : i32
    %c0_i32_0 = arith.constant 0 : i32
    %c0_i32_1 = arith.constant 0 : i32
    return %c0_i32, %c0_i32_0 : i32, i32
  }
  func.func @transform_2(%arg0: i32) -> (i32, i32) {
    %c0_i32 = arith.constant 0 : i32
    %c0_i32_0 = arith.constant 0 : i32
    %c0_i32_1 = arith.constant 0 : i32
    return %c0_i32, %c0_i32_0 : i32, i32
  }
  func.func @transform_3(%arg0: i32) -> (i32, i32) {
    %c0_i32 = arith.constant 0 : i32
    %c0_i32_0 = arith.constant 0 : i32
    %c0_i32_1 = arith.constant 0 : i32
    return %c0_i32, %c0_i32_0 : i32, i32
  }
  func.func @transform_4(%arg0: i32) -> (i32, i32) {
    %c0_i32 = arith.constant 0 : i32
    %c0_i32_0 = arith.constant 0 : i32
    %c0_i32_1 = arith.constant 0 : i32
    return %c0_i32, %c0_i32_0 : i32, i32
  }
  func.func @transform_5(%arg0: i32) -> (i32, i32) {
    %c0_i32 = arith.constant 0 : i32
    %c0_i32_0 = arith.constant 0 : i32
    %c0_i32_1 = arith.constant 0 : i32
    return %c0_i32, %c0_i32_0 : i32, i32
  }
  func.func @transform_6(%arg0: i32) -> (i32, i32, i32) {
    %c0_i32 = arith.constant 0 : i32
    %c0_i32_0 = arith.constant 0 : i32
    %c0_i32_1 = arith.constant 0 : i32
    return %arg0, %c0_i32, %c0_i32_0 : i32, i32, i32
  }
}

</mosaic_0001>

<bundles_post_ra>
// kernel: tpu_custom_call.1
= control target key start
LH: loop header
LB: loop body
LE: loop exit
PB: predicated region body
PF: predicated region fallthrough
CT: control target
= control target key end

     0   :  { %11 = vsyncpa [#allocation4], 0  ;;  %s1776_s0 = inlined_call_operand.vmem [shape: f32[2,4,256], index: 0, kind: input, shape index: {}]   ;;  %s1777_s1 = inlined_call_operand.hbm [shape: bf16[9,256], index: 1, kind: input, shape index: {}]   ;;  %s1778_s2 = inlined_call_operand.vmem [shape: bf16[8,36], index: 2, kind: input, shape index: {}]   ;;  %s1779_s3 = inlined_call_operand.vmem [shape: f32[8,1], index: 3, kind: input, shape index: {}]   ;;  %s1780_s4 = inlined_call_operand.vmem [shape: bf16[8,36], index: 4, kind: input, shape index: {}]   ;;  %s1781_s5 = inlined_call_operand.vmem [shape: f32[8,1], index: 5, kind: input, shape index: {}]   ;;  %s1782_s6 = inlined_call_operand.hbm [shape: f32[2,4,256], index: 6, kind: output, shape index: {}]  }
   0x1   :  { %12 = vsyncpa [#allocation5], 0 }
   0x2   :  { %14 = vsyncpa [#allocation5 + $0x1], 0  ;;  %s1342_s21 = smov 0   ;;  %s1344_s22 = smov 0  }
   0x3   :  { %s1346_s23 = smov 0   ;;  %s1348_s24 = smov 0  }
   0x4 LB: > { %s1363_s25 = sadd.s32 4294967295, %s1292_s24   ;;  %s1046_s26 = sadd.s32 4294967294, %s1292_s24   ;;  %s1292_s24 = sphi %s1348_s24, %s1843_s24   ;;  %s1288_s23 = sphi %s1346_s23, %s1842_s23   ;;  %s1284_s22 = sphi %s1344_s22, %s1841_s22   ;;  %s1280_s21 = sphi %s1342_s21, %s1840_s21  }
   0x5   : > { %s1367_s27 = sadd.s32 1, %s1292_s24   ;;  %s158_s28 = sadd.s32 1, %s1288_s23 }
   0x6   : > { %s155_s29 = ssub.s32 %s1292_s24, %s1367_s27  ;;  %p168_p0 = scmp.ne.s32.totalorder %s1288_s23, %s1284_s22 }
   0x7   : > { %p156_p1 = scmp.eq.s32.totalorder %s155_s29, 0  ;;  %p169_p2 = scmp.eq.s32.totalorder %s1363_s25, 1 }
   0x8   : > { %p174_p3 = scmp.ne.s32.totalorder %s1284_s22, %s1280_s21  ;;  %p175_p4 = scmp.eq.s32.totalorder %s1046_s26, 1 }
   0x9   : > { %s1378_s30 = scalar_select %p156_p1, %s1288_s23, %s158_s28  }
   0xa   : > { %p1380_p5 = por %p169_p2, %p168_p0  ;;  %p1384_p6 = por %p175_p4, %p174_p3 }
   0xb   : > { %p1047_p7 = scmp.ge.s32.totalorder %s1292_s24, 1  ;;  %p182_p8 = scmp.lt.s32.totalorder %s1292_s24, 3 }
   0xc   : > { %s1800_s7 = scalar_select %p1380_p5, 1, 0 }
   0xd   : > { %s1801_s8 = scalar_select %p1384_p6, 1, 0 }
   0xe   : > { %p1783_p9 = scmp.eq.s32.totalorder %s1363_s25, 0  ;;  %p1391_p10 = pnand %p1047_p7, %p182_p8 }
   0xf   : > { %s1294_s10 = smov [#allocation3]   ;;  %s1198_s15 = scalar_lea.hbm %s1777_s1, 256 }
  0x10   : > { %s1802_s9 = scalar_select %p1391_p10, 1, 0 }
  0x11   : > { %s194_s11 = sshll.u32 %s1294_s10, 4  ;;  %p1110_p11 = pneg %p1391_p10  ;;  %s195_s11 = int_to_ptr.vmem [resolvable:$true] %s194_s11 }
  0x12   : > { %p1199_p13 = scmp.ne.s32.totalorder %s1777_s1, %s1198_s15  ;;  %p1205_p3 = scmp.lt.u32.totalorder %s1198_s15, %s1777_s1 }
  0x13   : > { %p1399_p12 = pnand %p1783_p9, %p1110_p11 }
  0x15   : > { %p1200_p0 = pneg %p1399_p12 }
  0x17   : > { %p1201_p1 = pnand %p1200_p0, %p1199_p13 }
  0x19   : > { %p1202_p2 = pneg %p1201_p1 }
  0x1b   : > { %p1207_p4 = pnand %p1205_p3, %p1202_p2 }
  0x1d   : > { %1210 = shalt.err (!%p1207_p4)
}
  0x1e   : > { %s1211_s20 = scalar_lea.vmem %s195_s11, 256  ;;  %p1219_p9 = scmp.lt.s32.totalorder %s195_s11, %s195_s11 }
  0x1f   : > { %p1212_p7 = scmp.ne.s32.totalorder %s195_s11, %s1211_s20  ;;  %p1220_p6 = scmp.lt.s32.totalorder %s1211_s20, %s1211_s20 }
  0x21   : > { %p1214_p8 = pnand %p1212_p7, %p1200_p0  ;;  %p1221_p5 = por %p1220_p6, %p1219_p9 }
  0x23   : > { %p1215_p11 = pneg %p1214_p8 }
  0x25   : > { %p1222_p10 = pnand %p1221_p5, %p1215_p11 }
  0x27   : > { %1225 = shalt.err (!%p1222_p10)
}
  0x28   : > { %s1295_s26 = smov 128   ;;  %s1296_s28 = smov 8  }
  0x29   : > { %1113 = dma.hbm_to_vmem [thread:$0]  (!%p1399_p12), %s1777_s1, 256, %s195_s11, [#allocation4], %s1295_s26, %s1295_s26, %s1296_s28  }
  0x2a   : > { %p1804_p13 = scmp.ne.s32.totalorder %s1802_s9, 0 }
  0x2b   : > { %p1805_p1 = scmp.eq.s32.totalorder (!%p1804_p13), %s1363_s25, 0 }
  0x2c   : > { %230 = sbr.rel (%p1804_p13) target bundleno = 1007 (0x3ef), region = 44 }
  0x33   : > { %1271 = dma.done.wait (%p1805_p1), [#allocation4], 256   ;;  %p1806_p0 = pmov %p1805_p1 }
  0x34   : > { %v284_v0 = vlaneseq  ;;  %p260_p5 = scmp.lt.s32.totalorder %s1363_s25, 1  ;;  %v267_v2 = vld [vmem:[#allocation3] sm:$0xff]  ;;  %s1297_s9 = smov 111   ;;  %v268_v34 = vld [vmem:[#allocation3 + $0x8] sm:$0x11]  ;;  %vm274_vm0 = vcmask 132096  }
  0x35   : > { %1273 = vsyncadd (%p1806_p0), [#allocation4], 4294967040  ;;  %v1056_v3 = vcombine.high %v267_v2, %v267_v2  ;;  %v1055_v5 = vcombine.low %v267_v2, %v267_v2  ;;  %s1298_s16 = smov 113   ;;  %s1299_s17 = smov 127   ;;  %v1066_v35 = vcombine.high %v268_v34, %v268_v34  ;;  %v1065_v36 = vcombine.low %v268_v34, %v268_v34 }
  0x36   : > { %v285_v1 = vshrl.u32 %v284_v0, 7  ;;  %s261_s13 = scalar_select %p260_p5, %s1363_s25, 1  ;;  %v1303_v43 = vmov 0   ;;  %vm1792_vm1 = vcmask 115712   ;;  %vm1789_vm2 = vcmask 908288  }
  0x37   : > { %v289_v8 = vpack.i.b16 %v1056_v3, %v1056_v3  ;;  %v282_v9 = vpack.i.b16 %v1055_v5, %v1055_v5  ;;  %v324_v11 = vshrl.u32 %v1055_v5, 16  ;;  %v331_v16 = vshrl.u32 %v1056_v3, 16  ;;  %s1300_s18 = smov 112   ;;  %s1301_s19 = smov 1   ;;  %275 = vst.msk [vmem:[#allocation2] sm:$0x3] %vm274_vm0, %v1303_v43  ;;  %686 = vmatprep.mubr.bf16.mxu0 %v1303_v43  ;;  %1165 = vset.pattern.permute.xlu0 %v1303_v43 }
  0x38   : > { %s1102_s12 = sshll.u32 %s261_s13, 3  ;;  %v1430_v4 = vsub.s32 0, %v285_v1  ;;  %v370_v10 = vsub.s32 1, %v285_v1  ;;  %v441_v12 = vsub.s32 2, %v285_v1  ;;  %v496_v33 = vsub.s32 3, %v285_v1  ;;  %s1302_s20 = smov 16   ;;  %922 = vmatprep.mubr.bf16.mxu1 %v1303_v43 }
  0x39   : > { %s264_s11 = scalar_lea.vmem %s1776_s0, %s1102_s12  ;;  %v325_v22 = vpack.i.b16 %v324_v11, %v324_v11  ;;  %v332_v25 = vpack.i.b16 %v331_v16, %v331_v16  ;;  %v577_v39 = vpack.i.b16 %v1066_v35, %v1066_v35  ;;  %v570_v40 = vpack.i.b16 %v1065_v36, %v1065_v36  ;;  %s1304_s26 = smov 15   ;;  %367 = vst.msk [vmem:[#allocation2 + $0x8] sm:$0x3] %vm1792_vm1, %v1303_v43 }
  0x3a   : > { %v1432_v6 = vld [vmem:[%s264_s11] sm:$0xff]  ;;  %v294_v13 = vrot.slane %v289_v8, %v1430_v4  ;;  %v287_v14 = vrot.slane %v282_v9, %v1430_v4  ;;  %v1444_v17 = vrot.slane %v289_v8, %v441_v12  ;;  %v1450_v19 = vrot.slane %v282_v9, %v441_v12  ;;  %s1305_s28 = smov 17   ;;  %p1838_p9 = scmp.ne.s32.totalorder %s1800_s7, 0 }
  0x3b   : > { %v1436_v7 = vcombine.high %v1432_v6, %v1432_v6  ;;  %v1442_v15 = vpack.c.bf16 %v1432_v6, %v1432_v6  ;;  %v375_v20 = vrot.slane %v289_v8, %v370_v10  ;;  %v371_v21 = vrot.slane %v282_v9, %v370_v10 }
  0x3c   : > { %299 = vrot.lane.b32.xlu1 %v294_v13, %s1297_s9  ;;  %297 = vrot.lane.b32.xlu0 %v287_v14, %s1297_s9  ;;  %v407_v26 = vrot.slane %v325_v22, %v370_v10  ;;  %v330_v27 = vrot.slane %v325_v22, %v1430_v4  ;;  %v411_v29 = vrot.slane %v332_v25, %v370_v10  ;;  %vm1794_vm3 = vcmask 125954  }
  0x3d   : > { %v1448_v18 = vpack.c.bf16 %v1436_v7, %v1436_v7  ;;  %v447_v23 = vmul.bf16 %v1450_v19, %v1442_v15  ;;  %v337_v30 = vrot.slane %v332_v25, %v1430_v4  ;;  %v465_v31 = vrot.slane %v332_v25, %v441_v12  ;;  %323 = vst.msk [vmem:[#allocation2] sm:$0xc] %vm1794_vm3, %v1303_v43 }
  0x3e   : > { %v461_v32 = vrot.slane %v325_v22, %v441_v12  ;;  %v536_v37 = vrot.slane %v332_v25, %v496_v33  ;;  %v532_v38 = vrot.slane %v325_v22, %v496_v33  ;;  %v501_v41 = vrot.slane %v289_v8, %v496_v33 }
  0x3f   : > { %v448_v24 = vmul.bf16 %v1444_v17, %v1448_v18  ;;  %v497_v42 = vrot.slane %v282_v9, %v496_v33  ;;  %v582_v44 = vrot.slane %v577_v39, %v1430_v4  ;;  %v575_v45 = vrot.slane %v570_v40, %v1430_v4  ;;  %v613_v40 = vld [vmem:[%s1779_s3] sm:$0xff] }
  0x40   : > { %380 = vrot.lane.b32.xlu1 %v375_v20, %s1298_s16  ;;  %378 = vrot.lane.b32.xlu0 %v371_v21, %s1298_s16  ;;  %vm1798_vm4 = vcmask 924672   ;;  %vm418_vm5 = vcmask 1039360   ;;  %vm1799_vm6 = vcmask 916480   ;;  %vm1791_vm7 = vcmask 3074  }
  0x41   : > { %v1061_v28 = vcombine.low %v447_v23, %v448_v24  ;;  %403 = vst.msk [vmem:[#allocation2 + $0x8] sm:$0xc] %vm1791_vm7, %v1303_v43  ;;  %vm1790_vm8 = vcmask 1044474   ;;  %vm1796_vm9 = vcmask 7168   ;;  %vm1787_vm10 = vcmask 1044354  }
  0x42   : > { %457 = vst.msk [vmem:[#allocation2 + $0x14] sm:$0xc] %vm1790_vm8, %v1303_v43  ;;  %vm1797_vm11 = vcmask 130048   ;;  %vm1788_vm12 = vcmask 1042312   ;;  %vm1795_vm13 = vcmask 121856   ;;  %vm1786_vm14 = vcmask 1042296  }
  0x43   : > { %455 = vst [vmem:[#allocation2 + $0x10] sm:$0x33] %v1061_v28  ;;  %528 = vst.msk [vmem:[#allocation2 + $0x1c] sm:$0xc] %vm1787_vm10, %v1303_v43  ;;  %vm1793_vm15 = vcmask 138240   ;;  %vm319_vm10 = vcmask 1045508  }
  0x44   : > { %414 = vrot.lane.b32.xlu1 %v407_v26, %s1299_s17  ;;  %340 = vrot.lane.b32.xlu0 %v330_v27, %s1300_s18  ;;  %493 = vst.msk [vmem:[#allocation2 + $0x1c] sm:$0x3] %vm1788_vm12, %v1303_v43  ;;  %vm363_vm7 = vcmask 1047558   ;;  %vm488_vm3 = vcmask 1043458  }
  0x45   : > { %563 = vst.msk [vmem:[#allocation2 + $0x24] sm:$0x3] %vm1786_vm14, %v1303_v43  ;;  %vm318_vm14 = vcmask 1041544  }
  0x46   : > { %vm1586_vm12 = vmor %vm319_vm10, %vm318_vm14  ;;  %vm362_vm14 = vcmask 1043586  }
  0x47   : > { %vm1600_vm1 = vmor %vm363_vm7, %vm362_vm14 }
  0x48   : > { %416 = vrot.lane.b32.xlu1 %v411_v29, %s1299_s17  ;;  %342 = vrot.lane.b32.xlu0 %v337_v30, %s1300_s18 }
  0x4c   : > { %470 = vrot.lane.b32.xlu1 %v465_v31, %s1301_s19  ;;  %468 = vrot.lane.b32.xlu0 %v461_v32, %s1301_s19 }
  0x50   : > { %541 = vrot.lane.b32.xlu1 %v536_v37, %s1302_s20  ;;  %539 = vrot.lane.b32.xlu0 %v532_v38, %s1302_s20 }
  0x54   : > { %506 = vrot.lane.b32.xlu1 %v501_v41, %s1304_s26  ;;  %504 = vrot.lane.b32.xlu0 %v497_v42, %s1304_s26 }
  0x58   : > { %587 = vrot.lane.b32.xlu1 %v582_v44, %s1305_s28  ;;  %585 = vrot.lane.b32.xlu0 %v575_v45, %s1305_s28 }
  0xae   : > { %v1483_v46 = vpop.permute.xlu1 %299  ;;  %v298_v47 = vpop.permute.xlu0 %297 }
  0xaf   : > { %v306_v48 = vmul.bf16 %v1483_v46, %v1448_v18  ;;  %v1489_v49 = vsel %vm1789_vm2, %v298_v47, %v1483_v46  ;;  %vm399_vm2 = vcmask 1041528  }
  0xb0   : > { %v305_v50 = vmul.bf16 %v1489_v49, %v1442_v15  ;;  %vm1593_vm8 = vmor %vm319_vm10, %vm399_vm2  ;;  %vm489_vm2 = vcmask 1039366  }
  0xb1   : > { %vm1612_vm14 = vmor %vm489_vm2, %vm488_vm3 }
  0xb2   : > { %v1495_v51 = vpop.permute.xlu1 %380  ;;  %v379_v52 = vpop.permute.xlu0 %378  ;;  %v1057_v53 = vcombine.low %v305_v50, %v306_v48 }
  0xb3   : > { %v387_v54 = vmul.bf16 %v1495_v51, %v1448_v18  ;;  %v1501_v55 = vsel %vm1798_vm4, %v379_v52, %v1495_v51 }
  0xb4   : > { %v386_v56 = vmul.bf16 %v1501_v55, %v1442_v15  ;;  %312 = vrot.lane.b32.xlu0 %v1057_v53, %s1305_s28 }
  0xb6   : > { %v415_v57 = vpop.permute.xlu1 %414  ;;  %v341_v58 = vpop.permute.xlu0 %340  ;;  %v1059_v59 = vcombine.low %v386_v56, %v387_v54 }
  0xb8   : > { %393 = vrot.lane.b32.xlu0 %v1059_v59, %s1304_s26 }
  0xba   : > { %v1509_v60 = vpop.permute.xlu1 %416  ;;  %v1511_v61 = vpop.permute.xlu0 %342 }
  0xbb   : > { %v1515_v62 = vsel %vm418_vm5, %v415_v57, %v1509_v60  ;;  %v1519_v63 = vsel %vm1799_vm6, %v341_v58, %v1511_v61  ;;  %v349_v0 = vmul.bf16 %v1511_v61, %v1448_v18  ;;  %v423_v2 = vmul.bf16 %v1509_v60, %v1448_v18 }
  0xbc   : > { %v422_v1 = vmul.bf16 %v1515_v62, %v1442_v15  ;;  %v348_v3 = vmul.bf16 %v1519_v63, %v1442_v15 }
  0xbe   : > { %v471_v4 = vpop.permute.xlu1 %470  ;;  %v1533_v5 = vpop.permute.xlu0 %468  ;;  %v1058_v8 = vcombine.low %v348_v3, %v349_v0  ;;  %v1060_v13 = vcombine.low %v422_v1, %v423_v2 }
  0xbf   : > { %v1537_v9 = vsel %vm1796_vm9, %v1533_v5, %v471_v4  ;;  %v475_v10 = vmul.bf16 %v1533_v5, %v1442_v15 }
  0xc0   : > { %v476_v11 = vmul.bf16 %v1537_v9, %v1448_v18  ;;  %v355_v12 = vrot.slane %v1058_v8, 6  ;;  %v429_v24 = vrot.slane %v1060_v13, 6 }
  0xc2   : > { %v542_v14 = vpop.permute.xlu1 %541  ;;  %v1545_v16 = vpop.permute.xlu0 %539  ;;  %356 = vrot.lane.b32.xlu1 %v355_v12, %s1302_s20  ;;  %v1062_v20 = vcombine.low %v475_v10, %v476_v11 }
  0xc3   : > { %v1550_v21 = vsel %vm1797_vm11, %v1545_v16, %v542_v14  ;;  %v546_v22 = vmul.bf16 %v1545_v16, %v1442_v15 }
  0xc4   : > { %v547_v23 = vmul.bf16 %v1550_v21, %v1448_v18  ;;  %v482_v25 = vrot.slane %v1062_v20, 6 }
  0xc6   : > { %v507_v26 = vpop.permute.xlu1 %506  ;;  %v1558_v27 = vpop.permute.xlu0 %504  ;;  %430 = vrot.lane.b32.xlu1 %v429_v24, %s1301_s19  ;;  %483 = vrot.lane.b32.xlu0 %v482_v25, %s1299_s17  ;;  %v1064_v28 = vcombine.low %v546_v22, %v547_v23 }
  0xc7   : > { %v1564_v29 = vsel %vm1795_vm13, %v1558_v27, %v507_v26  ;;  %v511_v30 = vmul.bf16 %v1558_v27, %v1442_v15 }
  0xc8   : > { %v512_v31 = vmul.bf16 %v1564_v29, %v1448_v18  ;;  %v553_v32 = vrot.slane %v1064_v28, 6 }
  0xca   : > { %v588_v33 = vpop.permute.xlu1 %587  ;;  %v1570_v34 = vpop.permute.xlu0 %585  ;;  %554 = vrot.lane.b32.xlu0 %v553_v32, %s1300_s18  ;;  %v1063_v35 = vcombine.low %v511_v30, %v512_v31 }
  0xcb   : > { %v1575_v36 = vsel %vm1793_vm15, %v1570_v34, %v588_v33  ;;  %v592_v37 = vmul.bf16 %v1570_v34, %v1442_v15 }
  0xcc   : > { %v593_v38 = vmul.bf16 %v1575_v36, %v1448_v18  ;;  %518 = vrot.lane.b32.xlu1 %v1063_v35, %s1298_s16 }
  0xce   : > { %v1067_v39 = vcombine.low %v592_v37, %v593_v38  ;;  %616 = vperm.xlu0 %1165, %v613_v40  }
  0xd0   : > { %599 = vrot.lane.b32.xlu1 %v1067_v39, %s1297_s9 }
 0x126   : > { %v313_v41 = vpop.permute.xlu0 %312 }
 0x127   : > { %v314_v15 = vrot.slane %v313_v41, 4 }
 0x129   : > { %v316_v18 = vsel %vm1793_vm15, %v314_v15, %v313_v41  ;;  %vm436_vm15 = vcmask 1043466   ;;  %v612_v15 = vld [vmem:[%s1778_s2] sm:$0xf] }
 0x12a   : > { %321 = vst.msk [vmem:[#allocation2] sm:$0x33] %vm1586_vm12, %v316_v18  ;;  %v394_v44 = vpop.permute.xlu0 %393  ;;  %vm1607_vm10 = vmor %vm363_vm7, %vm436_vm15  ;;  %vm523_vm7 = vcmask 1041408   ;;  %vm524_vm15 = vcmask 922628  }
 0x12b   : > { %v395_v47 = vrot.slane %v394_v44, 4 }
 0x12d   : > { %v397_v48 = vsel %vm1795_vm13, %v395_v47, %v394_v44  ;;  %vm559_vm13 = vcmask 916486  }
 0x12e   : > { %401 = vst.msk [vmem:[#allocation2 + $0x8] sm:$0x33] %vm1593_vm8, %v397_v48  ;;  %vm1623_vm2 = vmor %vm559_vm13, %vm488_vm3  ;;  %vm1823_vm13 = vcmask 125954  }
 0x134   : > { %v357_v50 = vpop.permute.xlu1 %356 }
 0x135   : > { %v358_v53 = vrot.slane %v357_v50, 4 }
 0x137   : > { %v360_v54 = vsel %vm1797_vm11, %v358_v53, %v357_v50  ;;  %vm604_vm11 = vcmask 906244  }
 0x138   : > { %365 = vst.msk [vmem:[#allocation2] sm:$0xcc] %vm1600_vm1, %v360_v54  ;;  %v431_v57 = vpop.permute.xlu1 %430  ;;  %v484_v58 = vpop.permute.xlu0 %483  ;;  %vm1639_vm3 = vmor %vm604_vm11, %vm523_vm7  ;;  %vm1825_vm11 = vcmask 3074  }
 0x139   : > { %v432_v59 = vrot.slane %v431_v57, 4  ;;  %v485_v1 = vrot.slane %v484_v58, 4 }
 0x13b   : > { %v434_v2 = vsel %vm1796_vm9, %v432_v59, %v431_v57  ;;  %v486_v3 = vsel %vm418_vm5, %v484_v58, %v485_v1  ;;  %vm1629_vm9 = vmor %vm524_vm15, %vm523_vm7  ;;  %vm1824_vm15 = vcmask 115712  }
 0x13c   : > { %438 = vst.msk [vmem:[#allocation2 + $0x8] sm:$0xcc] %vm1607_vm10, %v434_v2  ;;  %v555_v4 = vpop.permute.xlu0 %554 }
 0x13d   : > { %491 = vst.msk [vmem:[#allocation2 + $0x10] sm:$0xcc] %vm1612_vm14, %v486_v3  ;;  %v556_v10 = vrot.slane %v555_v4, 4 }
 0x13e   : > { %v519_v11 = vpop.permute.xlu1 %518 }
 0x13f   : > { %v557_v12 = vsel %vm1799_vm6, %v555_v4, %v556_v10  ;;  %v520_v14 = vrot.slane %v519_v11, 4  ;;  %v607_v24 = vld [vmem:[#allocation2] sm:$0xff]  ;;  %vm1827_vm6 = vcmask 908288  }
 0x140   : > { %561 = vst.msk [vmem:[#allocation2 + $0x18] sm:$0xcc] %vm1623_vm2, %v557_v12 }
 0x141   : > { %v521_v20 = vsel %vm1798_vm4, %v519_v11, %v520_v14  ;;  %719 = vst.msk [vmem:[#allocation2] sm:$0x3] %vm274_vm0, %v1303_v43  ;;  %vm1826_vm4 = vcmask 1044474   ;;  %vm1828_vm0 = vcmask 1042312  }
 0x142   : > { %526 = vst.msk [vmem:[#allocation2 + $0x18] sm:$0x33] %vm1629_vm9, %v521_v20  ;;  %v600_v23 = vpop.permute.xlu1 %599 }
 0x143   : > { %v601_v25 = vrot.slane %v600_v23, 4  ;;  %v608_v26 = vld [vmem:[#allocation2 + $0x8] sm:$0xff]  ;;  %733 = vst.msk [vmem:[#allocation2] sm:$0xc] %vm1823_vm13, %v1303_v43  ;;  %vm1829_vm13 = vcmask 1044354  }
 0x144   : > { %v1171_v28 = vld [vmem:[#allocation2 + $0x4] ss:$8 sps:$4 sm:$0xff]   ;;  %v609_v30 = vld [vmem:[#allocation2 + $0x10] sm:$0xff]  ;;  %748 = vst.msk [vmem:[#allocation2 + $0x8] sm:$0x3] %vm1824_vm15, %v1303_v43  ;;  %v1068_v31 = vcombine.low %v607_v24, %v608_v26  ;;  %vm1831_vm15 = vcmask 121856  }
 0x145   : > { %762 = vst.msk [vmem:[#allocation2 + $0x8] sm:$0xc] %vm1825_vm11, %v1303_v43  ;;  %v602_v32 = vsel %vm1827_vm6, %v600_v23, %v601_v25  ;;  %654 = vmatprep.subr.bf16.mxu0 %v1171_v28  ;;  %vm644_vm6 = vcmask 293888   ;;  %vm1832_vm11 = vcmask 138240  }
 0x146   : > { %786 = vst.msk [vmem:[#allocation2 + $0x14] sm:$0xc] %vm1826_vm4, %v1303_v43  ;;  %655 = vmatpush1.bf16.msra.mxu0 %v1068_v31  ;;  %vm1830_vm4 = vcmask 1042296  }
 0x147   : > { %606 = vst.msk [vmem:[#allocation2 + $0x20] sm:$0x33] %vm1639_vm3, %v602_v32 }
 0x149   : > { %v610_v33 = vld [vmem:[#allocation2 + $0x18] sm:$0xff] }
 0x14a   : > { %801 = vst.msk [vmem:[#allocation2 + $0x1c] sm:$0x3] %vm1828_vm0, %v1303_v43  ;;  %v1071_v35 = vcombine.high %v609_v30, %v610_v33  ;;  %v1070_v37 = vcombine.low %v609_v30, %v610_v33  ;;  %vm1833_vm0 = vcmask 130048  }
 0x14b   : > { %815 = vst.msk [vmem:[#allocation2 + $0x1c] sm:$0xc] %vm1829_vm13, %v1303_v43 }
 0x14c   : > { %656 = vmatprep.subr.bf16.mxu0 %v1071_v35 }
 0x14d   : > { %657 = vmatpush1.bf16.msra.mxu0 %v1070_v37  ;;  %v617_v18 = vpop.permute.xlu0 %616 }
 0x14e   : > { %v611_v38 = vld [vmem:[#allocation2 + $0x20] sm:$0x33] }
 0x14f   : > { %v1073_v39 = vcombine.high %v611_v38, %v611_v38  ;;  %830 = vst.msk [vmem:[#allocation2 + $0x24] sm:$0x3] %vm1830_vm4, %v1303_v43  ;;  %v1072_v40 = vcombine.low %v611_v38, %v611_v38 }
 0x151   : > { %1074 = vmatprep.subr.msk.bf16.mxu0 %vm523_vm7, %v1073_v39  ;;  %v649_v41 = vsel %vm523_vm7, %v1072_v40, 0 }
 0x152   : > { %659 = vmatpush1.bf16.msra.mxu0 %v649_v41 }
 0x155   : > { %1075 = vmatmul.mubr.msk.bf16.vlgmr.msra.gmra.mrb[0].mxu0 %vm644_vm6, %v612_v15 }
 0x228   : > { %v688_v44 = vpop.f32.mrb[0].mxu0 }
 0x229   : > { %v689_v47 = vadd.f32 %v688_v44, %v617_v18  ;;  %v690_v48 = vpop.f32.mrb[1].mxu0 }
 0x22a   : > { %v691_v50 = vadd.f32 %v690_v48, %v617_v18  ;;  %v692_v53 = vpop.f32.mrb[2].mxu0 }
 0x22b   : > { %v1076_v43 = vmul.f32 -1.442695, %v689_v47  ;;  %v693_v54 = vpop.f32.mrb[3].mxu0 }
 0x22c   : > { %v1077_v57 = vmul.f32 -1.442695, %v691_v50 }
 0x22d   : > { %1182 = vpow2.f32 %v1076_v43 }
 0x22e   : > { %1184 = vpow2.f32 %v1077_v57 }
 0x237   : > { %v1183_v58 = vpop.eup %1182 }
 0x238   : > { %v1185_v59 = vpop.eup %1184  ;;  %v701_v1 = vadd.f32 1.0, %v1183_v58 }
 0x239   : > { %v702_v2 = vadd.f32 1.0, %v1185_v59 }
 0x23a   : > { %1186 = vrcp.f32 %v701_v1 }
 0x23b   : > { %1188 = vrcp.f32 %v702_v2 }
 0x244   : > { %v1187_v3 = vpop.eup %1186 }
 0x245   : > { %v1189_v4 = vpop.eup %1188  ;;  %v709_v10 = vrot.slane %v1187_v3, 4 }
 0x246   : > { %v710_v11 = vrot.slane %v1189_v4, 4 }
 0x247   : > { %v713_v12 = vmul.f32 %v709_v10, %v689_v47 }
 0x248   : > { %v714_v14 = vmul.f32 %v710_v11, %v691_v50 }
 0x249   : > { %v715_v20 = vmax.f32 %v713_v12, 0.0 }
 0x24a   : > { %v716_v23 = vmax.f32 %v714_v14, 0.0 }
 0x24b   : > { %v717_v24 = vpack.c.bf16 %v715_v20, %v715_v20 }
 0x24c   : > { %v718_v25 = vpack.c.bf16 %v716_v23, %v716_v23 }
 0x24d   : > { %v777_v26 = vmul.bf16 %v717_v24, %v1450_v19  ;;  %v749_v28 = vmul.bf16 %v717_v24, %v1501_v55  ;;  %v720_v30 = vmul.bf16 %v717_v24, %v1489_v49  ;;  %v787_v31 = vmul.bf16 %v717_v24, %v1533_v5 }
 0x24e   : > { %v778_v32 = vmul.bf16 %v718_v25, %v1444_v17  ;;  %v750_v33 = vmul.bf16 %v718_v25, %v1495_v51  ;;  %v721_v35 = vmul.bf16 %v718_v25, %v1483_v46  ;;  %v788_v37 = vmul.bf16 %v718_v25, %v1537_v9 }
 0x24f   : > { %v734_v38 = vmul.bf16 %v717_v24, %v1519_v63  ;;  %v735_v39 = vmul.bf16 %v718_v25, %v1511_v61  ;;  %v816_v19 = vmul.bf16 %v717_v24, %v1545_v16  ;;  %v817_v55 = vmul.bf16 %v718_v25, %v1550_v21 }
 0x250   : > { %v1080_v40 = vcombine.low %v749_v28, %v750_v33  ;;  %v1078_v49 = vcombine.low %v720_v30, %v721_v35  ;;  %v1083_v41 = vcombine.low %v787_v31, %v788_v37  ;;  %v763_v5 = vmul.bf16 %v717_v24, %v1515_v62  ;;  %v849_v31 = vld [vmem:[%s1780_s4] sm:$0xf] }
 0x251   : > { %v1079_v17 = vcombine.low %v734_v38, %v735_v39  ;;  %v1085_v15 = vcombine.low %v816_v19, %v817_v55  ;;  %v764_v51 = vmul.bf16 %v718_v25, %v1509_v60  ;;  %v802_v46 = vmul.bf16 %v717_v24, %v1558_v27 }
 0x252   : > { %756 = vrot.lane.b32.xlu0 %v1080_v40, %s1304_s26  ;;  %727 = vrot.lane.b32.xlu1 %v1078_v49, %s1305_s28  ;;  %v803_v61 = vmul.bf16 %v718_v25, %v1564_v29  ;;  %v831_v63 = vmul.bf16 %v717_v24, %v1570_v34  ;;  %v832_v9 = vmul.bf16 %v718_v25, %v1575_v36  ;;  %v794_v18 = vrot.slane %v1083_v41, 6  ;;  %v850_v29 = vld [vmem:[%s1781_s5] sm:$0xff] }
 0x253   : > { %v1081_v16 = vcombine.low %v763_v5, %v764_v51  ;;  %v1082_v21 = vcombine.low %v777_v26, %v778_v32  ;;  %v741_v62 = vrot.slane %v1079_v17, 6  ;;  %v823_v60 = vrot.slane %v1085_v15, 6 }
 0x254   : > { %v1084_v44 = vcombine.low %v802_v46, %v803_v61  ;;  %v1086_v47 = vcombine.low %v831_v63, %v832_v9 }
 0x255   : > { %785 = vst [vmem:[#allocation2 + $0x10] sm:$0x33] %v1082_v21  ;;  %v770_v27 = vrot.slane %v1081_v16, 6 }
 0x256   : > { %795 = vrot.lane.b32.xlu0 %v794_v18, %s1299_s17  ;;  %742 = vrot.lane.b32.xlu1 %v741_v62, %s1302_s20 }
 0x25a   : > { %824 = vrot.lane.b32.xlu0 %v823_v60, %s1300_s18  ;;  %771 = vrot.lane.b32.xlu1 %v770_v27, %s1301_s19  ;;  %s1103_s18 = sshll.u32 %s1363_s25, 7  ;;  %s1306_s25 = smov [#allocation6]  }
 0x25b   : > { %s1734_s29 = scalar_lea.hbm %s1782_s6, %s1103_s18  ;;  %s1230_s12 = sshll.u32 %s1306_s25, 4  ;;  %s1231_s12 = int_to_ptr.vmem [resolvable:$false] %s1230_s12 }
 0x25c   : > { %s1232_s14 = scalar_lea.vmem %s1231_s12, 256 }
 0x25e   : > { %853 = vperm.xlu0 %1165, %v850_v29   ;;  %809 = vrot.lane.b32.xlu1 %v1084_v44, %s1298_s16  ;;  %s257_s16 = sand.u32 1, %s1284_s22  }
 0x25f   : > { %s1052_s17 = sshll.u32 %s257_s16, 3  ;;  %s961_s10 = scalar_lea.sflag [#allocation5], %s257_s16 }
 0x260   : > { %s259_s19 = scalar_lea.vmem [#allocation6], %s1052_s17 }
 0x261   : > { %s975_s20 = sshll.u32 %s259_s19, 4  ;;  %s1736_s20 = int_to_ptr.vmem [resolvable:$true] %s975_s20 }
 0x262   : > { %838 = vrot.lane.b32.xlu1 %v1086_v47, %s1297_s9  ;;  %s1226_s13 = scalar_lea.vmem %s1736_s20, 128  ;;  %p1233_p2 = scmp.lt.s32.totalorder %s1736_s20, %s1231_s12 }
 0x263   : > { %p1227_p6 = scmp.ne.s32.totalorder %s1736_s20, %s1226_s13  ;;  %p1234_p3 = scmp.lt.s32.totalorder %s1232_s14, %s1226_s13 }
 0x265   : > { %p1228_p10 = pnand %p1227_p6, %p1838_p9  ;;  %p1235_p4 = por %p1234_p3, %p1233_p2 }
 0x267   : > { %p1229_p12 = pneg %p1228_p10 }
 0x269   : > { %p1236_p7 = pnand %p1235_p4, %p1229_p12 }
 0x2c4   : > { %v757_v34 = vpop.permute.xlu0 %756  ;;  %v728_v36 = vpop.permute.xlu1 %727 }
 0x2c5   : > { %v758_v48 = vrot.slane %v757_v34, 4  ;;  %v729_v50 = vrot.slane %v728_v36, 4 }
 0x2c7   : > { %v759_v53 = vsel %vm1831_vm15, %v758_v48, %v757_v34  ;;  %v730_v43 = vsel %vm1832_vm11, %v729_v50, %v728_v36 }
 0x2c8   : > { %761 = vst.msk [vmem:[#allocation2 + $0x8] sm:$0x33] %vm1593_vm8, %v759_v53  ;;  %v796_v54 = vpop.permute.xlu0 %795  ;;  %v743_v57 = vpop.permute.xlu1 %742  ;;  %vm1834_vm8 = vcmask 916480  }
 0x2c9   : > { %732 = vst.msk [vmem:[#allocation2] sm:$0x33] %vm1586_vm12, %v730_v43  ;;  %v797_v58 = vrot.slane %v796_v54, 4  ;;  %v744_v59 = vrot.slane %v743_v57, 4  ;;  %vm1835_vm12 = vcmask 7168  }
 0x2cb   : > { %v798_v1 = vsel %vm418_vm5, %v796_v54, %v797_v58  ;;  %v745_v2 = vsel %vm1833_vm0, %v744_v59, %v743_v57  ;;  %vm1836_vm5 = vcmask 924672  }
 0x2cc   : > { %800 = vst.msk [vmem:[#allocation2 + $0x10] sm:$0xcc] %vm1612_vm14, %v798_v1  ;;  %v825_v3 = vpop.permute.xlu0 %824  ;;  %v772_v45 = vpop.permute.xlu1 %771 }
 0x2cd   : > { %747 = vst.msk [vmem:[#allocation2] sm:$0xcc] %vm1600_vm1, %v745_v2  ;;  %v826_v4 = vrot.slane %v825_v3, 4  ;;  %v773_v10 = vrot.slane %v772_v45, 4  ;;  %vm1837_vm1 = vcmask 908288  }
 0x2cf   : > { %v827_v42 = vsel %vm1834_vm8, %v825_v3, %v826_v4  ;;  %v774_v11 = vsel %vm1835_vm12, %v773_v10, %v772_v45 }
 0x2d0   : > { %829 = vst.msk [vmem:[#allocation2 + $0x18] sm:$0xcc] %vm1623_vm2, %v827_v42  ;;  %v810_v12 = vpop.permute.xlu1 %809 }
 0x2d1   : > { %776 = vst.msk [vmem:[#allocation2 + $0x8] sm:$0xcc] %vm1607_vm10, %v774_v11  ;;  %v811_v0 = vrot.slane %v810_v12, 4 }
 0x2d3   : > { %v812_v14 = vsel %vm1836_vm5, %v810_v12, %v811_v0 }
 0x2d4   : > { %814 = vst.msk [vmem:[#allocation2 + $0x18] sm:$0x33] %vm1629_vm9, %v812_v14  ;;  %v839_v52 = vpop.permute.xlu1 %838 }
 0x2d5   : > { %v840_v20 = vrot.slane %v839_v52, 4 }
 0x2d7   : > { %v841_v23 = vsel %vm1837_vm1, %v839_v52, %v840_v20 }
 0x2d8   : > { %v1174_v24 = vld [vmem:[#allocation2 + $0x4] ss:$8 sps:$4 sm:$0xff]   ;;  %v1176_v25 = vld [vmem:[#allocation2] ss:$8 sps:$4 sm:$0xff]   ;;  %843 = vst.msk [vmem:[#allocation2 + $0x20] sm:$0x33] %vm1639_vm3, %v841_v23 }
 0x2d9   : > { %890 = vmatprep.subr.bf16.mxu1 %v1174_v24 }
 0x2da   : > { %891 = vmatpush1.bf16.msra.mxu1 %v1176_v25 }
 0x2db   : > { %v1177_v56 = vld [vmem:[#allocation2 + $0x14] ss:$8 sps:$4 sm:$0xff]   ;;  %v1179_v8 = vld [vmem:[#allocation2 + $0x10] ss:$8 sps:$4 sm:$0xff]  }
 0x2dc   : > { %892 = vmatprep.subr.bf16.mxu1 %v1177_v56 }
 0x2dd   : > { %v854_v22 = vpop.permute.xlu0 %853 }
 0x2de   : > { %893 = vmatpush1.bf16.msra.mxu1 %v1179_v8 }
 0x2df   : > { %v848_v26 = vld [vmem:[#allocation2 + $0x20] sm:$0x33] }
 0x2e0   : > { %v1092_v28 = vcombine.high %v848_v26, %v848_v26  ;;  %v1091_v30 = vcombine.low %v848_v26, %v848_v26 }
 0x2e2   : > { %1093 = vmatprep.subr.msk.bf16.mxu1 %vm523_vm7, %v1092_v28  ;;  %v885_v13 = vsel %vm523_vm7, %v1091_v30, 0 }
 0x2e3   : > { %895 = vmatpush1.bf16.msra.mxu1 %v885_v13 }
 0x2e6   : > { %1094 = vmatmul.mubr.msk.bf16.vlgmr.msra.gmra.mrb[0].mxu1 %vm644_vm6, %v849_v31 }
 0x3b9   : > { %v924_v32 = vpop.f32.mrb[0].mxu1 }
 0x3ba   : > { %v925_v33 = vadd.f32 %v924_v32, %v854_v22  ;;  %v926_v35 = vpop.f32.mrb[1].mxu1 }
 0x3bb   : > { %v927_v37 = vadd.f32 %v926_v35, %v854_v22  ;;  %v928_v38 = vpop.f32.mrb[2].mxu1 }
 0x3bc   : > { %v1095_v39 = vmul.f32 -1.442695, %v925_v33  ;;  %v929_v19 = vpop.f32.mrb[3].mxu1 }
 0x3bd   : > { %v1096_v55 = vmul.f32 -1.442695, %v927_v37 }
 0x3be   : > { %1190 = vpow2.f32 %v1095_v39 }
 0x3bf   : > { %1192 = vpow2.f32 %v1096_v55 }
 0x3c8   : > { %v1191_v40 = vpop.eup %1190 }
 0x3c9   : > { %v1193_v49 = vpop.eup %1192  ;;  %v937_v41 = vadd.f32 1.0, %v1191_v40 }
 0x3ca   : > { %v938_v5 = vadd.f32 1.0, %v1193_v49 }
 0x3cb   : > { %1194 = vrcp.f32 %v937_v41 }
 0x3cc   : > { %1196 = vrcp.f32 %v938_v5 }
 0x3d5   : > { %v1195_v17 = vpop.eup %1194 }
 0x3d6   : > { %v1197_v15 = vpop.eup %1196  ;;  %v945_v51 = vrot.slane %v1195_v17, 4 }
 0x3d7   : > { %v946_v46 = vrot.slane %v1197_v15, 4 }
 0x3d8   : > { %v949_v61 = vmul.f32 %v945_v51, %v925_v33 }
 0x3d9   : > { %v950_v63 = vmul.f32 %v946_v46, %v927_v37 }
 0x3da   : > { %v951_v9 = vadd.f32 %v949_v61, %v1432_v6 }
 0x3db   : > { %v952_v16 = vadd.f32 %v950_v63, %v1436_v7 }
 0x3dc   : > { %v953_v21 = vmax.f32 %v951_v9, 0.0 }
 0x3dd   : > { %v954_v18 = vmax.f32 %v952_v16, 0.0 }
 0x3df   : > { %v957_v62 = vcombine.low %v953_v21, %v954_v18 }
 0x3e1   : > { %959 = vst [vmem:[%s259_s19] sm:$0xff] %v957_v62 }
 0x3e2   : > { %1239 = shalt.err (!%p1236_p7)
}
 0x3e3   : > { %s1240_s15 = scalar_lea.hbm %s1734_s29, 128  ;;  %s1244_s16 = scalar_lea.hbm %s1782_s6, 256 }
 0x3e4   : > { %p1241_p8 = scmp.ne.s32.totalorder %s1734_s29, %s1240_s15  ;;  %p1245_p1 = scmp.lt.u32.totalorder %s1734_s29, %s1782_s6 }
 0x3e5   : > { %p1246_p0 = scmp.lt.u32.totalorder %s1244_s16, %s1240_s15  ;;  %p1248_p6 = scmp.lt.u32.totalorder %s1240_s15, %s1734_s29 }
 0x3e6   : > { %p1242_p11 = pnand %p1241_p8, %p1838_p9 }
 0x3e7   : > { %p1247_p5 = por %p1246_p0, %p1245_p1 }
 0x3e8   : > { %p1243_p13 = pneg %p1242_p11 }
 0x3e9   : > { %p1249_p10 = por %p1248_p6, %p1247_p5 }
 0x3eb   : > { %p1250_p12 = pnand %p1249_p10, %p1243_p13 }
 0x3ed   : > { %1253 = shalt.err (!%p1250_p12)
}
 0x3ee   : > { %1108 = dma.vmem_to_hbm [thread:$0]  (%p1838_p9), %s1736_s20, 128, %s1734_s29, %s961_s10  }
 0x3ef PF: > { %p1120_p2 = scmp.ge.s32.totalorder %s1292_s24, 2  ;;  %s987_s19 = sand.u32 1, %s1280_s21  }
 0x3f0   : > { %p1839_p3 = scmp.ne.s32.totalorder %s1801_s8, 0  ;;  %s988_s26 = scalar_lea.sflag [#allocation5], %s987_s19 }
 0x3f2   : > { %p1115_p4 = pnand %p1120_p2, %p1839_p3 }
 0x3f4   : > { %1275 = dma.done.wait (!%p1115_p4), %s988_s26, 128  }
 0x3f5   : > { %1277 = vsyncadd (!%p1115_p4), %s988_s26, 4294967168  ;;  %p17_p7 = scmp.ge.s32.totalorder %s1367_s27, 4   ;;  %s1840_s21 = smov %s1284_s22 }
 0x3f6   : > { %s1841_s22 = smov %s1288_s23  ;;  %s1842_s23 = smov %s1378_s30 }
 0x3f7   : > { %s1843_s24 = smov %s1367_s27  ;;  %19 = sbr.rel (!%p17_p7) target bundleno = 4 (0x4), region = 84 }
 0x3fe   :  { %993 = vsyncpa [#allocation4], 1 }
 0x3ff   :  { %995 = vsyncpa [#allocation4 + $0x1], 1 }
 0x400   :  { %996 = vsyncpa [#allocation5], 1 }
 0x401   :  { %998 = vsyncpa [#allocation5 + $0x1], 1 }

</bundles_post_ra>
